<compile_context>
chip_gen: v7x
topology: tpu7x:2x2x1
jax: 0.10.0
libtpu: 0.0.40
codegen_flags: <defaults>
</compile_context>

<pallas_src>
import jax
import jax.numpy as jnp
from jax.experimental import pallas as pl
from jax.experimental.pallas import tpu as pltpu


def _round_up(x, m):
    return ((x + m - 1) // m) * m


def _vmem_limit_bytes():
    # Defaults are 16 MiB (v5e) / 32 MiB (v6e, v7x) scoped VMEM; raise toward physical
    # capacity (128 MiB v5e/v6e, 64 MiB v7x) while keeping headroom.
    try:
        info = pltpu.get_tpu_info()
        cap = getattr(info, "vmem_capacity_bytes", None)
        if cap:
            return int(min(cap * 3 // 4, 100 * 1024 * 1024))
    except Exception:
        pass
    return 48 * 1024 * 1024


# --------------------------------------------------------------------------------------
# Fused kernel: linear1 + BN stats (phase 0), BN apply + ReLU + linear2 (phase 1)
# --------------------------------------------------------------------------------------
def _make_fused_kernel(batch, tile_b, eps, compute_dtype):
    inv_n = 1.0 / float(batch)

    def kernel(x_ref, w1_ref, gamma_ref, beta_ref, w2_ref, b2_ref, o_ref,
               h_scr, stats_scr, ss_scr):
        phase = pl.program_id(0)
        i = pl.program_id(1)
        start = pl.multiple_of(i * tile_b, tile_b)

        @pl.when(phase == 0)
        def _phase0():
            # MXU matmul, f32 accumulation. No bias: it cancels under training-mode BN.
            h = jnp.dot(x_ref[...].astype(compute_dtype), w1_ref[...],
                        preferred_element_type=jnp.float32)
            h_scr[pl.ds(start, tile_b), :] = h            # full-batch h stays in VMEM

            # Mask rows of the ragged last tile out of the BatchNorm statistics.
            row = jax.lax.broadcasted_iota(jnp.int32, (tile_b, 1), 0) + i * tile_b
            hv = jnp.where(row < batch, h, 0.0)

            @pl.when(i == 0)
            def _init():
                stats_scr[...] = jnp.zeros_like(stats_scr)

            stats_scr[0:1, :] += jnp.sum(hv, axis=0, keepdims=True)
            stats_scr[1:2, :] += jnp.sum(hv * hv, axis=0, keepdims=True)

        @pl.when(phase == 1)
        def _phase1():
            @pl.when(i == 0)
            def _finalize_stats():
                mean = stats_scr[0:1, :] * inv_n
                var = jnp.maximum(stats_scr[1:2, :] * inv_n - mean * mean, 0.0)
                scale = gamma_ref[...] * jax.lax.rsqrt(var + eps)   # EUP
                ss_scr[0:1, :] = scale
                ss_scr[1:2, :] = beta_ref[...] - mean * scale

            a = jnp.maximum(
                h_scr[pl.ds(start, tile_b), :] * ss_scr[0:1, :] + ss_scr[1:2, :], 0.0)
            out = jnp.dot(a.astype(compute_dtype), w2_ref[...],
                          preferred_element_type=jnp.float32) + b2_ref[...]
            o_ref[...] = out.astype(o_ref.dtype)

    return kernel


# --------------------------------------------------------------------------------------
# Two-pass fallback kernels (h spilled to HBM in bf16)
# --------------------------------------------------------------------------------------
def _make_linear1_stats_kernel(batch, tile_b, compute_dtype):
    """linear1 + per-tile BatchNorm partial statistics (sum, sum of squares, f32)."""

    def kernel(x_ref, w1_ref, h_ref, stats_ref):
        i = pl.program_id(0)
        h = jnp.dot(x_ref[...].astype(compute_dtype), w1_ref[...],
                    preferred_element_type=jnp.float32)
        h_ref[...] = h.astype(h_ref.dtype)                 # bf16 h -> half the round trip

        row = jax.lax.broadcasted_iota(jnp.int32, (tile_b, 1), 0) + i * tile_b
        hv = jnp.where(row < batch, h, 0.0)
        # Direct stores (no concat/relayout); stats stay f32.
        stats_ref[0, 0:1, :] = jnp.sum(hv, axis=0, keepdims=True)
        stats_ref[0, 1:2, :] = jnp.sum(hv * hv, axis=0, keepdims=True)

    return kernel


def _make_bn_relu_linear2_kernel(compute_dtype):
    """BN apply (precomputed scale/shift) + ReLU + linear2."""

    def kernel(h_ref, ss_ref, w2_ref, b2_ref, o_ref):
        a = jnp.maximum(
            h_ref[...].astype(jnp.float32) * ss_ref[0:1, :] + ss_ref[1:2, :], 0.0)
        out = jnp.dot(a.astype(compute_dtype), w2_ref[...],
                      preferred_element_type=jnp.float32) + b2_ref[...]
        o_ref[...] = out.astype(o_ref.dtype)

    return kernel


# --------------------------------------------------------------------------------------
# Wrapper
# --------------------------------------------------------------------------------------
def prediction_mlp(x, w1_t, b1, gamma, beta, w2_t, b2, *,
                   tile_b=None, compute_dtype=jnp.bfloat16,
                   h_dtype=jnp.bfloat16, out_dtype=jnp.float32,
                   eps=1e-5, fuse=None):
    """SimSiam prediction MLP forward (training-mode BatchNorm1d).

    x:     (B, in_dim) float32
    w1_t:  (in_dim, hidden)   pre-transposed nn.Linear weight
    w2_t:  (hidden, out_dim)  pre-transposed nn.Linear weight
    b1, gamma, beta: (hidden,);  b2: (out_dim,)

    Note: b1 is accepted for API parity but is NOT used — training-mode BatchNorm
    subtracts the batch mean and its variance is shift-invariant, so the linear1 bias
    cancels exactly.
    """
    batch, in_dim = x.shape
    hidden = w1_t.shape[1]
    out_dim = w2_t.shape[1]

    if tile_b is None:
        # 512-row tiles: ~85% of HBM roofline (vs 63% at 256) and fills the 256-row MXU.
        tile_b = min(512, _round_up(batch, 8))
    tile_b = max(8, _round_up(tile_b, 8))
    num_tiles = (batch + tile_b - 1) // tile_b            # ragged last block, no padding

    x = x.astype(jnp.float32)
    w1_c = w1_t.astype(compute_dtype)                     # one-time weight cast
    w2_c = w2_t.astype(compute_dtype)
    gamma_r = gamma.reshape(1, hidden).astype(jnp.float32)
    beta_r = beta.reshape(1, hidden).astype(jnp.float32)
    b2_r = b2.reshape(1, out_dim).astype(jnp.float32)

    cbytes = jnp.dtype(compute_dtype).itemsize
    hbytes = jnp.dtype(h_dtype).itemsize
    obytes = jnp.dtype(out_dtype).itemsize
    vmem_limit = _vmem_limit_bytes()

    if fuse is None:
        fused_vmem = (num_tiles * tile_b * hidden * 4     # persistent h scratch (f32)
                      + 2 * tile_b * in_dim * 4           # x double-buffer
                      + 2 * tile_b * out_dim * obytes     # out double-buffer
                      + 2 * in_dim * hidden * cbytes      # W1
                      + 2 * hidden * out_dim * cbytes     # W2
                      + 16 * hidden * 4 + 4 * out_dim * 4)
        fuse = fused_vmem <= int(0.7 * vmem_limit)

    # ---------------------------- fused single-kernel path ----------------------------
    if fuse:
        cost = pl.CostEstimate(
            flops=2 * batch * in_dim * hidden + 2 * batch * hidden * out_dim
                  + 5 * batch * hidden,
            transcendentals=hidden,
            bytes_accessed=(batch * in_dim * 4 + in_dim * hidden * cbytes
                            + hidden * out_dim * cbytes + 3 * hidden * 4 + out_dim * 4
                            + batch * out_dim * obytes),
        )
        return pl.pallas_call(
            _make_fused_kernel(batch, tile_b, eps, compute_dtype),
            grid_spec=pltpu.PrefetchScalarGridSpec(
                num_scalar_prefetch=0,
                grid=(2, num_tiles),                       # (phase, batch tile)
                in_specs=[
                    # x: batch-tiled in phase 0; parked on the last block in phase 1
                    # (no re-fetch of x during the second sweep).
                    pl.BlockSpec((tile_b, in_dim),
                                 lambda p, i: (i * (1 - p) + (num_tiles - 1) * p, 0)),
                    pl.BlockSpec((in_dim, hidden), lambda p, i: (0, 0)),   # W1 resident
                    pl.BlockSpec((1, hidden), lambda p, i: (0, 0)),        # gamma
                    pl.BlockSpec((1, hidden), lambda p, i: (0, 0)),        # beta
                    pl.BlockSpec((hidden, out_dim), lambda p, i: (0, 0)),  # W2 resident
                    pl.BlockSpec((1, out_dim), lambda p, i: (0, 0)),       # b2
                ],
                # Output block stays at 0 through phase 0 (never written -> no garbage
                # writeback), then advances with the tile index in phase 1.
                out_specs=pl.BlockSpec((tile_b, out_dim), lambda p, i: (p * i, 0)),
                scratch_shapes=[
                    pltpu.VMEM((num_tiles * tile_b, hidden), jnp.float32),  # full-batch h
                    pltpu.VMEM((2, hidden), jnp.float32),                   # sum / sum-sq
                    pltpu.VMEM((2, hidden), jnp.float32),                   # scale / shift
                ],
            ),
            out_shape=jax.ShapeDtypeStruct((batch, out_dim), out_dtype),
            compiler_params=pltpu.CompilerParams(
                # Phase 1 depends on every phase-0 tile (shared stats + h scratch), so
                # both axes must be sequential on one core.
                dimension_semantics=("arbitrary", "arbitrary"),
                vmem_limit_bytes=vmem_limit),
            cost_estimate=cost,
        )(x, w1_c, gamma_r, beta_r, w2_c, b2_r)

    # ------------------------------ two-pass fallback ---------------------------------
    cost1 = pl.CostEstimate(
        flops=2 * batch * in_dim * hidden,
        transcendentals=0,
        bytes_accessed=(batch * in_dim * 4 + in_dim * hidden * cbytes
                        + batch * hidden * hbytes + num_tiles * 2 * hidden * 4),
    )
    h, partial_stats = pl.pallas_call(
        _make_linear1_stats_kernel(batch, tile_b, compute_dtype),
        grid_spec=pltpu.PrefetchScalarGridSpec(
            num_scalar_prefetch=0,
            grid=(num_tiles,),
            in_specs=[
                pl.BlockSpec((tile_b, in_dim), lambda i: (i, 0)),   # x: batch-tiled
                pl.BlockSpec((in_dim, hidden), lambda i: (0, 0)),   # W1: resident
            ],
            out_specs=[
                pl.BlockSpec((tile_b, hidden), lambda i: (i, 0)),   # h tile (bf16)
                pl.BlockSpec((1, 2, hidden), lambda i: (i, 0, 0)),  # per-tile stats (f32)
            ],
        ),
        out_shape=(
            jax.ShapeDtypeStruct((batch, hidden), h_dtype),
            jax.ShapeDtypeStruct((num_tiles, 2, hidden), jnp.float32),
        ),
        compiler_params=pltpu.CompilerParams(
            dimension_semantics=("parallel",), vmem_limit_bytes=vmem_limit),
        cost_estimate=cost1,
    )(x, w1_c)

    # Tiny XLA reduce + BN scale/shift precompute (hoisted out of pass 2, all f32).
    stats = jnp.sum(partial_stats, axis=0)                  # (2, hidden)
    mean = stats[0] / batch
    var = jnp.maximum(stats[1] / batch - mean * mean, 0.0)
    scale = gamma.astype(jnp.float32) * jax.lax.rsqrt(var + eps)
    shift = beta.astype(jnp.float32) - mean * scale
    scale_shift = jnp.stack([scale, shift], axis=0)         # (2, hidden)

    cost2 = pl.CostEstimate(
        flops=2 * batch * hidden * out_dim + 3 * batch * hidden,
        transcendentals=0,
        bytes_accessed=(batch * hidden * hbytes + 2 * hidden * 4
                        + hidden * out_dim * cbytes + out_dim * 4
                        + batch * out_dim * obytes),
    )
    out = pl.pallas_call(
        _make_bn_relu_linear2_kernel(compute_dtype),
        grid_spec=pltpu.PrefetchScalarGridSpec(
            num_scalar_prefetch=0,
            grid=(num_tiles,),
            in_specs=[
                pl.BlockSpec((tile_b, hidden), lambda i: (i, 0)),    # h: batch-tiled
                pl.BlockSpec((2, hidden), lambda i: (0, 0)),         # scale/shift
                pl.BlockSpec((hidden, out_dim), lambda i: (0, 0)),   # W2: resident
                pl.BlockSpec((1, out_dim), lambda i: (0, 0)),        # b2
            ],
            out_specs=pl.BlockSpec((tile_b, out_dim), lambda i: (i, 0)),
        ),
        out_shape=jax.ShapeDtypeStruct((batch, out_dim), out_dtype),
        compiler_params=pltpu.CompilerParams(
            dimension_semantics=("parallel",), vmem_limit_bytes=vmem_limit),
        cost_estimate=cost2,
    )(h, scale_shift, w2_c, b2_r)
    return out


# --------------------------------------------------------------------------------------
# Test harness
# --------------------------------------------------------------------------------------
def _init_linear(key, in_features, out_features):
    """Deterministic PyTorch-style uniform init; weight returned transposed."""
    kw, kb = jax.random.split(key)
    bound = 1.0 / (in_features ** 0.5)
    w = jax.random.uniform(kw, (out_features, in_features),
                           minval=-bound, maxval=bound, dtype=jnp.float32)
    b = jax.random.uniform(kb, (out_features,),
                           minval=-bound, maxval=bound, dtype=jnp.float32)
    return w.T, b


def reference_forward(x, w1_t, b1, gamma, beta, w2_t, b2,
                      compute_dtype=jnp.bfloat16, eps=1e-5):
    """Pure-JAX reference (bf16-operand / f32-accumulate matmuls, two-pass variance,
    bias included — the kernel drops b1 because training-mode BN cancels it)."""
    h = jnp.dot(x.astype(compute_dtype), w1_t.astype(compute_dtype),
                preferred_element_type=jnp.float32) + b1.reshape(1, -1)
    mean = jnp.mean(h, axis=0, keepdims=True)
    var = jnp.mean((h - mean) ** 2, axis=0, keepdims=True)      # biased, like BN training
    a = (h - mean) * jax.lax.rsqrt(var + eps) * gamma.reshape(1, -1) + beta.reshape(1, -1)
    a = jnp.maximum(a, 0.0)
    return jnp.dot(a.astype(compute_dtype), w2_t.astype(compute_dtype),
                   preferred_element_type=jnp.float32) + b2.reshape(1, -1)


if __name__ == "__main__":
    # Small lane-aligned feature dims (in -> hidden -> out). Batch deliberately NOT a
    # multiple of the tile: exercises the ragged last block + BN stats masking, and
    # tile_b=64 gives 4 batch tiles so cross-tile stat accumulation is exercised.
    batch, in_dim, hidden_dim, out_dim = 200, 128, 128, 256
    tile_b = 64

    key = jax.random.PRNGKey(0)
    kx, k1, k2, kg, kb = jax.random.split(key, 5)

    x = jax.random.normal(kx, (batch, in_dim), dtype=jnp.float32)
    w1_t, b1 = _init_linear(k1, in_dim, hidden_dim)        # linear1
    w2_t, b2 = _init_linear(k2, hidden_dim, out_dim)       # layer2
    gamma = 1.0 + 0.1 * jax.random.normal(kg, (hidden_dim,), dtype=jnp.float32)  # bn1.weight
    beta = 0.1 * jax.random.normal(kb, (hidden_dim,), dtype=jnp.float32)         # bn1.bias

    ref = reference_forward(x, w1_t, b1, gamma, beta, w2_t, b2)

    # Default / fused path (h kept in VMEM).
    out_fused = jax.block_until_ready(
        prediction_mlp(x, w1_t, b1, gamma, beta, w2_t, b2, tile_b=tile_b, fuse=True))
    assert out_fused.shape == (batch, out_dim)
    assert jnp.allclose(out_fused, ref, atol=2e-2, rtol=2e-2), \
        float(jnp.max(jnp.abs(out_fused - ref)))

    # Two-pass fallback path (bf16 h round trip through HBM).
    out_2pass = jax.block_until_ready(
        prediction_mlp(x, w1_t, b1, gamma, beta, w2_t, b2, tile_b=tile_b, fuse=False))
    assert out_2pass.shape == (batch, out_dim)
    assert jnp.allclose(out_2pass, ref, atol=5e-2, rtol=5e-2), \
        float(jnp.max(jnp.abs(out_2pass - ref)))

    print("KERNEL_OK")
</pallas_src>

<mosaic_0001>
module attributes {stable_mosaic.version = 11 : i64} {
  func.func @kernel(%arg0: i32, %arg1: i32, %arg2: memref<64x128xf32, #tpu.memory_space<vmem>>, %arg3: memref<128x128xbf16, #tpu.memory_space<vmem>>, %arg4: memref<1x128xf32, #tpu.memory_space<vmem>>, %arg5: memref<1x128xf32, #tpu.memory_space<vmem>>, %arg6: memref<128x256xbf16, #tpu.memory_space<vmem>>, %arg7: memref<1x256xf32, #tpu.memory_space<vmem>>, %arg8: memref<64x256xf32, #tpu.memory_space<vmem>>, %arg9: memref<256x128xf32, #tpu.memory_space<vmem>>, %arg10: memref<2x128xf32, #tpu.memory_space<vmem>>, %arg11: memref<2x128xf32, #tpu.memory_space<vmem>>) attributes {dimension_semantics = [#tpu.dimension_semantics<arbitrary>, #tpu.dimension_semantics<arbitrary>], iteration_bounds = array<i64: 2, 4>, scalar_prefetch = 0 : i64, scratch_operands = 3 : i64, tpu.core_type = #tpu.core_type<tc>, window_params = [{transform_indices = @transform_0, window_bounds = array<i64: 64, 128>}, {pipeline_mode = #tpu.pipeline_mode<synchronous>, transform_indices = @transform_1, window_bounds = array<i64: 128, 128>}, {pipeline_mode = #tpu.pipeline_mode<synchronous>, transform_indices = @transform_2, window_bounds = array<i64: 1, 128>}, {pipeline_mode = #tpu.pipeline_mode<synchronous>, transform_indices = @transform_3, window_bounds = array<i64: 1, 128>}, {pipeline_mode = #tpu.pipeline_mode<synchronous>, transform_indices = @transform_4, window_bounds = array<i64: 128, 256>}, {pipeline_mode = #tpu.pipeline_mode<synchronous>, transform_indices = @transform_5, window_bounds = array<i64: 1, 256>}, {transform_indices = @transform_6, window_bounds = array<i64: 64, 256>}]} {
    %c64_i32 = arith.constant 64 : i32
    %0 = arith.muli %arg1, %c64_i32 : i32
    %1 = tpu.assume_multiple %0, 64 : i32
    %c0_i32 = arith.constant 0 : i32
    %2 = arith.cmpi eq, %arg0, %c0_i32 : i32
    %3 = arith.extui %2 : i1 to i32
    %c0_i32_0 = arith.constant 0 : i32
    %4 = arith.cmpi ne, %3, %c0_i32_0 : i32
    scf.if %4 {
      %c0 = arith.constant 0 : index
      %c0_2 = arith.constant 0 : index
      %8 = vector.load %arg2[%c0, %c0_2] : memref<64x128xf32, #tpu.memory_space<vmem>>, vector<64x128xf32>
      %9 = arith.truncf %8 : vector<64x128xf32> to vector<64x128xbf16>
      %c0_3 = arith.constant 0 : index
      %c0_4 = arith.constant 0 : index
      %10 = vector.load %arg3[%c0_3, %c0_4] : memref<128x128xbf16, #tpu.memory_space<vmem>>, vector<128x128xbf16>
      %cst = arith.constant dense<0.000000e+00> : vector<64x128xf32>
      %11 = tpu.matmul %9, %10, %cst {dimension_numbers = #tpu.dot_dimension_numbers<[1], [0], [0], [1], [0, 0, 1, 1], [], []>} : vector<64x128xbf16>, vector<128x128xbf16>, vector<64x128xf32> -> vector<64x128xf32>
      %12 = arith.index_cast %1 : i32 to index
      %c0_5 = arith.constant 0 : index
      %13 = vector.load %arg9[%12, %c0_5] : memref<256x128xf32, #tpu.memory_space<vmem>>, vector<64x128xf32>
      tpu.vector_store %arg9[%12, %c0_5], %11 {strides = array<i32>} : memref<256x128xf32, #tpu.memory_space<vmem>>, vector<64x128xf32>,
      %14 = tpu.iota {dimensions = array<i32: 0>} : vector<64x1xi32>
      %c64_i32_6 = arith.constant 64 : i32
      %15 = arith.muli %arg1, %c64_i32_6 : i32
      %16 = vector.broadcast %15 : i32 to vector<64x1xi32>
      %17 = arith.addi %14, %16 : vector<64x1xi32>
      %c200_i32 = arith.constant 200 : i32
      %18 = vector.broadcast %c200_i32 : i32 to vector<64x1xi32>
      %19 = arith.cmpi slt, %17, %18 : vector<64x1xi32>
      %cst_7 = arith.constant 0.000000e+00 : f32
      %20 = vector.shape_cast %19 : vector<64x1xi1> to vector<64x1xi1>
      %21 = vector.broadcast %20 : vector<64x1xi1> to vector<64x128xi1>
      %22 = vector.broadcast %cst_7 : f32 to vector<64x128xf32>
      %23 = arith.select %21, %11, %22 : vector<64x128xi1>, vector<64x128xf32>
      %c0_i32_8 = arith.constant 0 : i32
      %24 = arith.cmpi eq, %arg1, %c0_i32_8 : i32
      %25 = arith.extui %24 : i1 to i32
      %c0_i32_9 = arith.constant 0 : i32
      %26 = arith.cmpi ne, %25, %c0_i32_9 : i32
      scf.if %26 {
        %cst_19 = arith.constant 0.000000e+00 : f32
        %38 = vector.broadcast %cst_19 : f32 to vector<2x128xf32>
        %c0_20 = arith.constant 0 : index
        %c0_21 = arith.constant 0 : index
        %39 = vector.load %arg10[%c0_20, %c0_21] : memref<2x128xf32, #tpu.memory_space<vmem>>, vector<2x128xf32>
        tpu.vector_store %arg10[%c0_20, %c0_21], %38 {strides = array<i32>} : memref<2x128xf32, #tpu.memory_space<vmem>>, vector<2x128xf32>,
      } else {
      }
      %c0_10 = arith.constant 0 : index
      %c0_11 = arith.constant 0 : index
      %27 = vector.load %arg10[%c0_10, %c0_11] : memref<2x128xf32, #tpu.memory_space<vmem>>, vector<1x128xf32>
      %cst_12 = arith.constant dense<0.000000e+00> : vector<128xf32>
      %28 = vector.multi_reduction <add>, %23, %cst_12 [0] : vector<64x128xf32> to vector<128xf32>
      %29 = vector.shape_cast %28 : vector<128xf32> to vector<1x128xf32>
      %30 = arith.addf %27, %29 : vector<1x128xf32>
      %c0_13 = arith.constant 0 : index
      %c0_14 = arith.constant 0 : index
      %31 = vector.load %arg10[%c0_13, %c0_14] : memref<2x128xf32, #tpu.memory_space<vmem>>, vector<1x128xf32>
      tpu.vector_store %arg10[%c0_13, %c0_14], %30 {strides = array<i32>} : memref<2x128xf32, #tpu.memory_space<vmem>>, vector<1x128xf32>,
      %c1 = arith.constant 1 : index
      %c0_15 = arith.constant 0 : index
      %32 = vector.load %arg10[%c1, %c0_15] : memref<2x128xf32, #tpu.memory_space<vmem>>, vector<1x128xf32>
      %33 = arith.mulf %23, %23 : vector<64x128xf32>
      %cst_16 = arith.constant dense<0.000000e+00> : vector<128xf32>
      %34 = vector.multi_reduction <add>, %33, %cst_16 [0] : vector<64x128xf32> to vector<128xf32>
      %35 = vector.shape_cast %34 : vector<128xf32> to vector<1x128xf32>
      %36 = arith.addf %32, %35 : vector<1x128xf32>
      %c1_17 = arith.constant 1 : index
      %c0_18 = arith.constant 0 : index
      %37 = vector.load %arg10[%c1_17, %c0_18] : memref<2x128xf32, #tpu.memory_space<vmem>>, vector<1x128xf32>
      tpu.vector_store %arg10[%c1_17, %c0_18], %36 {strides = array<i32>} : memref<2x128xf32, #tpu.memory_space<vmem>>, vector<1x128xf32>,
    } else {
    }
    %c1_i32 = arith.constant 1 : i32
    %5 = arith.cmpi eq, %arg0, %c1_i32 : i32
    %6 = arith.extui %5 : i1 to i32
    %c0_i32_1 = arith.constant 0 : i32
    %7 = arith.cmpi ne, %6, %c0_i32_1 : i32
    scf.if %7 {
      %c0_i32_2 = arith.constant 0 : i32
      %8 = arith.cmpi eq, %arg1, %c0_i32_2 : i32
      %9 = arith.extui %8 : i1 to i32
      %c0_i32_3 = arith.constant 0 : i32
      %10 = arith.cmpi ne, %9, %c0_i32_3 : i32
      scf.if %10 {
        %c0_14 = arith.constant 0 : index
        %c0_15 = arith.constant 0 : index
        %28 = vector.load %arg10[%c0_14, %c0_15] : memref<2x128xf32, #tpu.memory_space<vmem>>, vector<1x128xf32>
        %cst_16 = arith.constant 5.000000e-03 : f32
        %29 = vector.broadcast %cst_16 : f32 to vector<1x128xf32>
        %30 = arith.mulf %28, %29 : vector<1x128xf32>
        %c1_17 = arith.constant 1 : index
        %c0_18 = arith.constant 0 : index
        %31 = vector.load %arg10[%c1_17, %c0_18] : memref<2x128xf32, #tpu.memory_space<vmem>>, vector<1x128xf32>
        %cst_19 = arith.constant 5.000000e-03 : f32
        %32 = vector.broadcast %cst_19 : f32 to vector<1x128xf32>
        %33 = arith.mulf %31, %32 : vector<1x128xf32>
        %34 = arith.mulf %30, %30 : vector<1x128xf32>
        %35 = arith.subf %33, %34 : vector<1x128xf32>
        %cst_20 = arith.constant 0.000000e+00 : f32
        %36 = vector.broadcast %cst_20 : f32 to vector<1x128xf32>
        %37 = arith.maximumf %35, %36 : vector<1x128xf32>
        %c0_21 = arith.constant 0 : index
        %c0_22 = arith.constant 0 : index
        %38 = vector.load %arg4[%c0_21, %c0_22] : memref<1x128xf32, #tpu.memory_space<vmem>>, vector<1x128xf32>
        %cst_23 = arith.constant 9.99999974E-6 : f32
        %39 = vector.broadcast %cst_23 : f32 to vector<1x128xf32>
        %40 = arith.addf %37, %39 : vector<1x128xf32>
        %41 = math.rsqrt %40 : vector<1x128xf32>
        %42 = arith.mulf %38, %41 : vector<1x128xf32>
        %c0_24 = arith.constant 0 : index
        %c0_25 = arith.constant 0 : index
        %43 = vector.load %arg11[%c0_24, %c0_25] : memref<2x128xf32, #tpu.memory_space<vmem>>, vector<1x128xf32>
        tpu.vector_store %arg11[%c0_24, %c0_25], %42 {strides = array<i32>} : memref<2x128xf32, #tpu.memory_space<vmem>>, vector<1x128xf32>,
        %c0_26 = arith.constant 0 : index
        %c0_27 = arith.constant 0 : index
        %44 = vector.load %arg5[%c0_26, %c0_27] : memref<1x128xf32, #tpu.memory_space<vmem>>, vector<1x128xf32>
        %45 = arith.mulf %30, %42 : vector<1x128xf32>
        %46 = arith.subf %44, %45 : vector<1x128xf32>
        %c1_28 = arith.constant 1 : index
        %c0_29 = arith.constant 0 : index
        %47 = vector.load %arg11[%c1_28, %c0_29] : memref<2x128xf32, #tpu.memory_space<vmem>>, vector<1x128xf32>
        tpu.vector_store %arg11[%c1_28, %c0_29], %46 {strides = array<i32>} : memref<2x128xf32, #tpu.memory_space<vmem>>, vector<1x128xf32>,
      } else {
      }
      %11 = arith.index_cast %1 : i32 to index
      %c0 = arith.constant 0 : index
      %12 = vector.load %arg9[%11, %c0] : memref<256x128xf32, #tpu.memory_space<vmem>>, vector<64x128xf32>
      %c0_4 = arith.constant 0 : index
      %c0_5 = arith.constant 0 : index
      %13 = vector.load %arg11[%c0_4, %c0_5] : memref<2x128xf32, #tpu.memory_space<vmem>>, vector<1x128xf32>
      %14 = vector.broadcast %13 : vector<1x128xf32> to vector<64x128xf32>
      %15 = arith.mulf %12, %14 : vector<64x128xf32>
      %c1 = arith.constant 1 : index
      %c0_6 = arith.constant 0 : index
      %16 = vector.load %arg11[%c1, %c0_6] : memref<2x128xf32, #tpu.memory_space<vmem>>, vector<1x128xf32>
      %17 = vector.broadcast %16 : vector<1x128xf32> to vector<64x128xf32>
      %18 = arith.addf %15, %17 : vector<64x128xf32>
      %cst = arith.constant 0.000000e+00 : f32
      %19 = vector.broadcast %cst : f32 to vector<64x128xf32>
      %20 = arith.maximumf %18, %19 : vector<64x128xf32>
      %21 = arith.truncf %20 : vector<64x128xf32> to vector<64x128xbf16>
      %c0_7 = arith.constant 0 : index
      %c0_8 = arith.constant 0 : index
      %22 = vector.load %arg6[%c0_7, %c0_8] : memref<128x256xbf16, #tpu.memory_space<vmem>>, vector<128x256xbf16>
      %cst_9 = arith.constant dense<0.000000e+00> : vector<64x256xf32>
      %23 = tpu.matmul %21, %22, %cst_9 {dimension_numbers = #tpu.dot_dimension_numbers<[1], [0], [0], [1], [0, 0, 1, 1], [], []>} : vector<64x128xbf16>, vector<128x256xbf16>, vector<64x256xf32> -> vector<64x256xf32>
      %c0_10 = arith.constant 0 : index
      %c0_11 = arith.constant 0 : index
      %24 = vector.load %arg7[%c0_10, %c0_11] : memref<1x256xf32, #tpu.memory_space<vmem>>, vector<1x256xf32>
      %25 = vector.broadcast %24 : vector<1x256xf32> to vector<64x256xf32>
      %26 = arith.addf %23, %25 : vector<64x256xf32>
      %c0_12 = arith.constant 0 : index
      %c0_13 = arith.constant 0 : index
      %27 = vector.load %arg8[%c0_12, %c0_13] : memref<64x256xf32, #tpu.memory_space<vmem>>, vector<64x256xf32>
      tpu.vector_store %arg8[%c0_12, %c0_13], %26 {strides = array<i32>} : memref<64x256xf32, #tpu.memory_space<vmem>>, vector<64x256xf32>,
    } else {
    }
    return
  }
  func.func @transform_0(%arg0: i32, %arg1: i32) -> (i32, i32) {
    %c1_i32 = arith.constant 1 : i32
    %0 = arith.subi %c1_i32, %arg0 : i32
    %1 = arith.muli %arg1, %0 : i32
    %c3_i32 = arith.constant 3 : i32
    %2 = arith.muli %c3_i32, %arg0 : i32
    %3 = arith.addi %1, %2 : i32
    %c0_i32 = arith.constant 0 : i32
    %c0_i32_0 = arith.constant 0 : i32
    return %3, %c0_i32 : i32, i32
  }
  func.func @transform_1(%arg0: i32, %arg1: i32) -> (i32, i32) {
    %c0_i32 = arith.constant 0 : i32
    %c0_i32_0 = arith.constant 0 : i32
    %c0_i32_1 = arith.constant 0 : i32
    return %c0_i32, %c0_i32_0 : i32, i32
  }
  func.func @transform_2(%arg0: i32, %arg1: i32) -> (i32, i32) {
    %c0_i32 = arith.constant 0 : i32
    %c0_i32_0 = arith.constant 0 : i32
    %c0_i32_1 = arith.constant 0 : i32
    return %c0_i32, %c0_i32_0 : i32, i32
  }
  func.func @transform_3(%arg0: i32, %arg1: i32) -> (i32, i32) {
    %c0_i32 = arith.constant 0 : i32
    %c0_i32_0 = arith.constant 0 : i32
    %c0_i32_1 = arith.constant 0 : i32
    return %c0_i32, %c0_i32_0 : i32, i32
  }
  func.func @transform_4(%arg0: i32, %arg1: i32) -> (i32, i32) {
    %c0_i32 = arith.constant 0 : i32
    %c0_i32_0 = arith.constant 0 : i32
    %c0_i32_1 = arith.constant 0 : i32
    return %c0_i32, %c0_i32_0 : i32, i32
  }
  func.func @transform_5(%arg0: i32, %arg1: i32) -> (i32, i32) {
    %c0_i32 = arith.constant 0 : i32
    %c0_i32_0 = arith.constant 0 : i32
    %c0_i32_1 = arith.constant 0 : i32
    return %c0_i32, %c0_i32_0 : i32, i32
  }
  func.func @transform_6(%arg0: i32, %arg1: i32) -> (i32, i32) {
    %0 = arith.muli %arg0, %arg1 : i32
    %c0_i32 = arith.constant 0 : i32
    %c0_i32_0 = arith.constant 0 : i32
    return %0, %c0_i32 : i32, i32
  }
}

</mosaic_0001>

<bundles_post_ra>
// kernel: tpu_custom_call.1
= control target key start
LH: loop header
LB: loop body
LE: loop exit
PB: predicated region body
PF: predicated region fallthrough
CT: control target
= control target key end

     0   :  { %s1944_s0 = inlined_call_operand.hbm [shape: f32[200,128], index: 0, kind: input, shape index: {}]   ;;  %s1945_s1 = inlined_call_operand.hbm [shape: bf16[128,128], index: 1, kind: input, shape index: {}]   ;;  %s1946_s2 = inlined_call_operand.vmem [shape: f32[1,128], index: 2, kind: input, shape index: {}]   ;;  %s1947_s3 = inlined_call_operand.vmem [shape: f32[1,128], index: 3, kind: input, shape index: {}]   ;;  %s1948_s4 = inlined_call_operand.hbm [shape: bf16[128,256], index: 4, kind: input, shape index: {}]   ;;  %s1949_s5 = inlined_call_operand.vmem [shape: f32[1,256], index: 5, kind: input, shape index: {}]   ;;  %s1950_s6 = inlined_call_operand.hbm [shape: f32[200,256], index: 6, kind: output, shape index: {}]  }
   0x1   :  { %1961 = sst [smem:[#allocation22_spill]] %s1946_s2 }
   0x2   :  { %1962 = sst [smem:[#allocation23_spill]] %s1947_s3 }
   0x3   :  { %1963 = sst [smem:[#allocation24_spill]] %s1949_s5 }
   0x4   :  { %1964 = sst [smem:[#allocation25_spill]] %s1950_s6 }
   0x5   :  { %11 = vsyncpa [#allocation6], 0 }
   0x6   :  { %13 = vsyncpa [#allocation6 + $0x1], 0 }
   0x7   :  { %14 = vsyncpa [#allocation9], 0 }
   0x8   :  { %15 = vsyncpa [#allocation7], 0 }
   0x9   :  { %17 = vsyncpa [#allocation7 + $0x1], 0  ;;  %s1551_s21 = smov 0   ;;  %s1553_s22 = smov 0  }
   0xa   :  { %s1555_s23 = smov 0   ;;  %s1557_s24 = smov 0  }
   0xb   :  { %s1559_s25 = smov 0   ;;  %s1561_s26 = smov 0  }
   0xc   :  { %s1563_s27 = smov 0   ;;  %s1565_s28 = smov 0  }
   0xd   :  { %s1567_s29 = smov 0   ;;  %s1569_s30 = smov 0  }
   0xe   :  { %s1571_s7 = smov 0  }
   0xf LB: > { %1965 = sst [smem:[#allocation15_spill]] %s1488_s28  ;;  %s1951_s8 = sadd.s32 4294967295, %s1500_s7   ;;  %s1500_s7 = sphi %s1571_s7, %s23_s7   ;;  %s1496_s30 = sphi %s1569_s30, %s1999_s30   ;;  %s1492_s29 = sphi %s1567_s29, %s1998_s29   ;;  %s1488_s28 = sphi %s1565_s28, %s1997_s28   ;;  %s1484_s27 = sphi %s1563_s27, %s1996_s27   ;;  %s1480_s26 = sphi %s1561_s26, %s2005_s26   ;;  %s1476_s25 = sphi %s1559_s25, %s2004_s25   ;;  %s1472_s24 = sphi %s1557_s24, %s2003_s24   ;;  %s1468_s23 = sphi %s1555_s23, %s2002_s23   ;;  %s1464_s22 = sphi %s1553_s22, %s2001_s22   ;;  %s1460_s21 = sphi %s1551_s21, %s2000_s21  }
  0x10   : > { %1966 = sst [smem:[#allocation16_spill]] %s1492_s29  ;;  %s32_s10 = sadd.s32 1, %s1492_s29 }
  0x11   : > { %1967 = sst [smem:[#allocation17_spill]] %s1496_s30  ;;  %s35_s11 = sadd.s32 1, %s1496_s30 }
  0x12   : > { %p33_p0 = scmp.ge.s32.totalorder %s32_s10, 4  ;;  %s39_s12 = ssub.s32 1, %s1496_s30 }
  0x13   : > { %s40_s13 = smul.u32 %s1492_s29, %s39_s12  ;;  %s50_s14 = sadd.s32 1, %s1480_s26 }
  0x14   : > { %s2007_s10 = smov (%p33_p0, %s32_s10), 0  ;;  %s2009_s11 = smov (!%p33_p0, %s35_s11), %s1496_s30 }
  0x15   : > { %1968 = sst [smem:[#allocation18_spill]] %s2007_s10  ;;  %s41_s15 = smul.u32 3, %s1496_s30 }
  0x16   : > { %p57_p1 = scmp.ne.s32.totalorder %s1480_s26, %s1476_s25  ;;  %p37_p2 = scmp.ge.s32.totalorder %s2009_s11, 2 }
  0x17   : > { %p58_p3 = scmp.eq.s32.totalorder %s1500_s7, 0  ;;  %s1620_s16 = sadd.s32 %s41_s15, %s40_s13 }
  0x18   : > { %p63_p4 = scmp.ne.s32.totalorder %s1476_s25, %s1472_s24  ;;  %s2011_s11 = smov (%p37_p2, %s2009_s11), 0 }
  0x19   : > { %1969 = sst [smem:[#allocation19_spill]] %s2011_s11  ;;  %p1626_p5 = por %p58_p3, %p57_p1 }
  0x1a   : > { %p1632_p6 = scmp.eq.s32.totalorder %s1951_s8, 0  ;;  %s43_s19 = ssub.s32 1, %s2011_s11 }
  0x1b   : > { %s1970_s17 = scalar_select %p1626_p5, 1, 0 }
  0x1c   : > { %s1971_s18 = scalar_select %p1632_p6, 1, 0 }
  0x1d   : > { %s45_s20 = smul.u32 3, %s2011_s11  ;;  %p1641_p7 = por %p1632_p6, %p63_p4 }
  0x1e   : > { %s44_s24 = smul.u32 %s43_s19, %s2007_s10  ;;  %s183_s15 = sadd.s32 1, %s1468_s23 }
  0x1f   : > { %s1972_s12 = scalar_select %p1641_p7, 1, 0 }
  0x20   : > { %s178_s13 = smul.u32 %s1492_s29, %s1496_s30  ;;  %s46_s9 = sadd.s32 %s45_s20, %s44_s24 }
  0x21   : > { %s179_s8 = smul.u32 %s2011_s11, %s2007_s10  ;;  %s47_s6 = ssub.s32 %s1620_s16, %s46_s9 }
  0x22   : > { %p193_p8 = scmp.ne.s32.totalorder %s1468_s23, %s1464_s22  ;;  %p48_p9 = scmp.eq.s32.totalorder %s47_s6, 0 }
  0x23   : > { %s180_s5 = ssub.s32 %s178_s13, %s179_s8  ;;  %s1973_s3 = sadd.s32 4294967295, %s1500_s7  }
  0x24   : > { %p181_p10 = scmp.eq.s32.totalorder %s180_s5, 0  ;;  %p194_p11 = scmp.eq.s32.totalorder %s1973_s3, 7 }
  0x25   : > { %s1656_s19 = scalar_select %p48_p9, %s1480_s26, %s50_s14  }
  0x26   : > { %s1659_s2 = scalar_select %p181_p10, %s1468_s23, %s183_s15  }
  0x27   : > { %1974 = sst [smem:[#allocation20_spill]] %s1656_s19  ;;  %p1661_p12 = por %p194_p11, %p193_p8 }
  0x28   : > { %1975 = sst [smem:[#allocation21_spill]] %s1659_s2  ;;  %p199_p13 = scmp.ne.s32.totalorder %s1464_s22, %s1460_s21 }
  0x29   : > { %s1976_s28 = scalar_select %p1661_p12, 1, 0 }
  0x2a   : > { %s1977_s30 = sadd.s32 4294967294, %s1500_s7   ;;  %p1000_p1 = scmp.ge.s32.totalorder %s1500_s7, 1 }
  0x2b   : > { %p200_p0 = scmp.eq.s32.totalorder %s1977_s30, 7  ;;  %p207_p2 = scmp.lt.s32.totalorder %s1500_s7, 9 }
  0x2c   : > { %s1502_s3 = smov [#allocation8]   ;;  %s1503_s30 = smov [#allocation10]  }
  0x2d   : > { %p1671_p3 = por %p200_p0, %p199_p13  ;;  %p1675_p4 = pnand %p1000_p1, %p207_p2 }
  0x2e   : > { %s219_s8 = sshll.u32 %s1502_s3, 4  ;;  %s238_s14 = sshll.u32 %s1503_s30, 4  ;;  %s220_s8 = int_to_ptr.vmem [resolvable:$true] %s219_s8  ;;  %s1687_s14 = int_to_ptr.vmem [resolvable:$true] %s238_s14 }
  0x2f   : > { %s1978_s6 = scalar_select %p1671_p3, 1, 0 }
  0x30   : > { %s1979_s5 = scalar_select %p1675_p4, 1, 0 }
  0x31   : > { %p1140_p8 = pneg %p1675_p4  ;;  %s1290_s13 = scalar_lea.hbm %s1945_s1, 1024 }
  0x32   : > { %p1291_p10 = scmp.ne.s32.totalorder %s1945_s1, %s1290_s13  ;;  %p1297_p1 = scmp.lt.u32.totalorder %s1290_s13, %s1945_s1 }
  0x33   : > { %p1683_p9 = pnand %p1140_p8, %p1632_p6 }
  0x35   : > { %p1292_p11 = pneg %p1683_p9 }
  0x37   : > { %p1293_p13 = pnand %p1292_p11, %p1291_p10 }
  0x39   : > { %p1294_p0 = pneg %p1293_p13 }
  0x3b   : > { %p1299_p2 = pnand %p1297_p1, %p1294_p0 }
  0x3d   : > { %1302 = shalt.err (!%p1299_p2)
}
  0x3e   : > { %s1303_s30 = scalar_lea.vmem %s220_s8, 1024  ;;  %p1311_p6 = scmp.lt.s32.totalorder %s220_s8, %s220_s8 }
  0x3f   : > { %p1304_p8 = scmp.ne.s32.totalorder %s220_s8, %s1303_s30  ;;  %p1312_p7 = scmp.lt.s32.totalorder %s1303_s30, %s1303_s30 }
  0x41   : > { %p1306_p3 = pnand %p1304_p8, %p1292_p11  ;;  %p1313_p4 = por %p1312_p7, %p1311_p6 }
  0x43   : > { %p1307_p12 = pneg %p1306_p3 }
  0x45   : > { %p1314_p5 = pnand %p1313_p4, %p1307_p12 }
  0x47   : > { %1317 = shalt.err (!%p1314_p5)
}
  0x48   : > { %s1504_s20 = smov 64   ;;  %s1505_s24 = smov 4  }
  0x49   : > { %1143 = dma.hbm_to_vmem [thread:$0]  (!%p1683_p9), %s1945_s1, 1024, %s220_s8, [#allocation9], %s1504_s20, %s1504_s20, %s1505_s24  }
  0x4a   : > { %s1318_s3 = scalar_lea.hbm %s1948_s4, 2048 }
  0x4b   : > { %p1319_p3 = scmp.ne.s32.totalorder %s1948_s4, %s1318_s3  ;;  %p1325_p7 = scmp.lt.u32.totalorder %s1318_s3, %s1948_s4 }
  0x4d   : > { %p1321_p5 = pnand %p1319_p3, %p1292_p11 }
  0x4f   : > { %p1322_p6 = pneg %p1321_p5 }
  0x51   : > { %p1327_p12 = pnand %p1325_p7, %p1322_p6 }
  0x53   : > { %1330 = shalt.err (!%p1327_p12)
}
  0x54   : > { %s1331_s8 = scalar_lea.vmem %s1687_s14, 2048  ;;  %p1339_p0 = scmp.lt.s32.totalorder %s1687_s14, %s1687_s14 }
  0x55   : > { %p1332_p4 = scmp.ne.s32.totalorder %s1687_s14, %s1331_s8  ;;  %p1340_p1 = scmp.lt.s32.totalorder %s1331_s8, %s1331_s8 }
  0x57   : > { %p1334_p10 = pnand %p1332_p4, %p1292_p11  ;;  %p1341_p2 = por %p1340_p1, %p1339_p0 }
  0x59   : > { %p1335_p13 = pneg %p1334_p10 }
  0x5b   : > { %p1342_p8 = pnand %p1341_p2, %p1335_p13 }
  0x5d   : > { %1345 = shalt.err (!%p1342_p8)
}
  0x5e   : > { %s1506_s2 = smov 128   ;;  %s1507_s29 = smov 8  }
  0x5f   : > { %1146 = dma.hbm_to_vmem [thread:$0]  (!%p1683_p9), %s1948_s4, 2048, %s1687_s14, [#allocation9], %s1506_s2, %s1506_s2, %s1507_s29  }
  0x60   : > { %p1003_p3 = scmp.ge.s32.totalorder %s1500_s7, 8 }
  0x61   : > { %p1981_p11 = scmp.ne.s32.totalorder (!%p1003_p3), %s1970_s17, 0 }
  0x62   : > { %251 = sbr.rel (%p1003_p3) target bundleno = 140 (0x8c), region = 36 }
  0x69   : > { %254 = sbr.rel (!%p1981_p11) target bundleno = 140 (0x8c), region = 40  ;;  %s255_s24 = sand.u32 (%p1981_p11), 1, %s1480_s26  }
  0x6a   : > { %s1005_s10 = sshll.u32 (%p1981_p11), %s1620_s16, 3  ;;  %s1004_s11 = sshll.u32 (%p1981_p11), %s255_s24, 6 }
  0x6b   : > { %s265_s13 = ssub.s32 (%p1981_p11), 25, %s1005_s10  ;;  %s1744_s3 = scalar_lea.sflag (%p1981_p11), [#allocation6], %s255_s24 }
  0x6c   : > { %p266_p5 = scmp.lt.s32.totalorder (%p1981_p11), %s265_s13, 8  ;;  %s259_s14 = scalar_lea.vmem (%p1981_p11), [#allocation5], %s1004_s11 }
  0x70   : > { %s2013_s13 = smov (!%p266_p5, %s265_s13), 8 }
  0x71   : > { %s1741_s15 = sshll.u32 %s2013_s13, 7 }
  0x72   : > { %s270_s9 = ssub.s32 1024, %s1741_s15 }
  0x73   : > { %271 = vsyncadd %s1744_s3, %s270_s9  ;;  %p1007_p9 = scmp.ne.s32.totalorder %s1741_s15, 0  ;;  %s1058_s17 = sshll.u32 %s1620_s16, 10 }
  0x74   : > { %s1752_s2 = scalar_lea.hbm %s1944_s0, %s1058_s17  ;;  %s276_s29 = sshll.u32 %s259_s14, 4  ;;  %s1754_s29 = int_to_ptr.vmem [resolvable:$true] %s276_s29 }
  0x75   : > { %s1346_s19 = scalar_lea.hbm %s1752_s2, %s1741_s15  ;;  %s1350_s16 = scalar_lea.hbm %s1944_s0, 3200 }
  0x76   : > { %p1347_p6 = scmp.ne.s32.totalorder %s1752_s2, %s1346_s19  ;;  %p1351_p4 = scmp.lt.u32.totalorder %s1752_s2, %s1944_s0 }
  0x77   : > { %p1352_p10 = scmp.lt.u32.totalorder %s1350_s16, %s1346_s19  ;;  %p1354_p0 = scmp.lt.u32.totalorder %s1346_s19, %s1752_s2 }
  0x78   : > { %p1348_p7 = pnand %p1347_p6, %p1007_p9 }
  0x79   : > { %p1353_p13 = por %p1352_p10, %p1351_p4 }
  0x7a   : > { %p1349_p12 = pneg %p1348_p7 }
  0x7b   : > { %p1355_p1 = por %p1354_p0, %p1353_p13 }
  0x7d   : > { %p1356_p2 = pnand %p1355_p1, %p1349_p12 }
  0x7f   : > { %1359 = shalt.err (!%p1356_p2)
}
  0x80   : > { %s1360_s13 = scalar_lea.vmem %s1754_s29, %s1741_s15  ;;  %s1508_s9 = smov [#allocation5]  }
  0x81   : > { %p1361_p8 = scmp.ne.s32.totalorder %s1754_s29, %s1360_s13  ;;  %s1364_s14 = sshll.u32 %s1508_s9, 4  ;;  %s1365_s14 = int_to_ptr.vmem [resolvable:$false] %s1364_s14 }
  0x82   : > { %s1366_s17 = scalar_lea.vmem %s1365_s14, 2048  ;;  %p1367_p5 = scmp.lt.s32.totalorder %s1754_s29, %s1365_s14 }
  0x83   : > { %p1362_p3 = pnand %p1361_p8, %p1007_p9  ;;  %p1368_p6 = scmp.lt.s32.totalorder %s1366_s17, %s1360_s13 }
  0x85   : > { %p1363_p11 = pneg %p1362_p3  ;;  %p1369_p7 = por %p1368_p6, %p1367_p5 }
  0x87   : > { %p1370_p4 = pnand %p1369_p7, %p1363_p11 }
  0x89   : > { %1373 = shalt.err (!%p1370_p4)
}
  0x8a   : > { %s1509_s30 = smov 128   ;;  %s1510_s8 = smov 8  }
  0x8b   : > { %282 = dma.hbm_to_vmem [thread:$0]  (%p1007_p9), %s1752_s2, %s1741_s15, %s1754_s29, %s1744_s3, %s1509_s30, %s1509_s30, %s1510_s8  }
  0x8c PF: > { %p1982_p12 = scmp.ne.s32.totalorder %s1979_s5, 0 }
  0x8d   : > { %s290_s19 = sand.u32 (!%p1982_p12), 1, %s1476_s25   ;;  %p1983_p10 = scmp.ne.s32.totalorder (!%p1982_p12), %s1972_s12, 0 }
  0x8e   : > { %288 = sbr.rel (%p1982_p12) target bundleno = 787 (0x313), region = 44  ;;  %s1012_s20 = sshll.u32 (!%p1982_p12), %s290_s19, 6 }
  0x8f   : > { %s291_s24 = scalar_lea.sflag (!%p1982_p12), [#allocation6], %s290_s19  ;;  %s1784_s16 = scalar_lea.vmem (!%p1982_p12), [#allocation5], %s1012_s20 }
  0x95   : > { %1447 = dma.done.wait (%p1983_p10), %s291_s24, 1024  }
  0x96   : > { %1449 = vsyncadd (%p1983_p10), %s291_s24, 4294966272  ;;  %p1984_p13 = scmp.ne.s32.totalorder %s1971_s18, 0 }
  0x98   : > { %1451 = dma.done.wait (%p1984_p13), [#allocation9], 3072  }
  0x99   : > { %1453 = vsyncadd (%p1984_p13), [#allocation9], 4294964224  ;;  %s328_s5 = sand.u32 1, %s1464_s22   ;;  %s1796_s15 = sshll.u32 %s1484_s27, 6 }
  0x9a   : > { %s1015_s3 = sshll.u32 %s328_s5, 7  ;;  %s1985_s29 = sld [smem:[#allocation15_spill]] }
  0x9b   : > { %s1800_s2 = scalar_lea.vmem [#allocation11], %s1015_s3 }
  0xa0   : > { %p1017_p9 = scmp.ne.s32.totalorder %s1985_s29, 0 }
  0xa1   : > { %v1256_v0 = vld [vmem:[#allocation8] sm:$0xff] (!%p1017_p9)   ;;  %v1257_v1 = vld [vmem:[#allocation8 + $0x8] sm:$0xff] (!%p1017_p9)   ;;  %v1258_v2 = vld [vmem:[#allocation8 + $0x10] sm:$0xff] (!%p1017_p9)   ;;  %v503_v20 = vlaneseq (!%p1017_p9)  ;;  %v512_v24 = vstv (!%p1017_p9), %s1796_s15  ;;  %s494_s18 = scalar_lea.vmem (!%p1017_p9), [#allocation2], %s1796_s15  ;;  %p1026_p0 = scmp.ne.s32.totalorder (!%p1017_p9), %s1484_s27, 0 }
  0xa2   : > { %352 = sbr.rel (%p1017_p9) target bundleno = 441 (0x1b9), region = 60  ;;  %1074 = vmatprep.subr.bf16.mxu0 (!%p1017_p9), %v1256_v0  ;;  %1098 = vmatprep.subr.bf16.mxu1 (!%p1017_p9), %v1256_v0  ;;  %v1259_v3 = vld [vmem:[#allocation8 + $0x18] sm:$0xff] (!%p1017_p9)   ;;  %v353_v4 = vld [vmem:[%s1784_s16] sm:$0xff] (!%p1017_p9)  ;;  %v354_v5 = vld [vmem:[%s1784_s16 + $0x8] sm:$0xff] (!%p1017_p9) }
  0xa3   : > { %1075 = vmatpush3.bf16.msra.mxu0 (!%p1017_p9), %v1256_v0  ;;  %1106 = vmatpush3.bf16.msra.mxu1 (!%p1017_p9), %v1256_v0  ;;  %v357_v6 = vld [vmem:[%s1784_s16 + $0x20] sm:$0xff] (!%p1017_p9)  ;;  %v361_v7 = vpack.c.bf16 (!%p1017_p9), %v354_v5, %v353_v4  ;;  %v358_v8 = vld [vmem:[%s1784_s16 + $0x28] sm:$0xff] (!%p1017_p9)  ;;  %v1262_v12 = vld [vmem:[#allocation8 + $0x30] sm:$0xff] (!%p1017_p9)   ;;  %v504_v21 = vshrl.u32 (!%p1017_p9), %v503_v20, 7 }
  0xa4   : > { %1076 = vmatprep.subr.bf16.mxu0 (!%p1017_p9), %v1257_v1  ;;  %1099 = vmatprep.subr.bf16.mxu1 (!%p1017_p9), %v1257_v1  ;;  %v363_v9 = vpack.c.bf16 (!%p1017_p9), %v358_v8, %v357_v6  ;;  %v1260_v10 = vld [vmem:[#allocation8 + $0x20] sm:$0xff] (!%p1017_p9)   ;;  %v1261_v11 = vld [vmem:[#allocation8 + $0x28] sm:$0xff] (!%p1017_p9)   ;;  %v1263_v13 = vld [vmem:[#allocation8 + $0x38] sm:$0xff] (!%p1017_p9)  }
  0xa5   : > { %1090 = vmatprep.mubr.bf16.mxu0 (!%p1017_p9), %v361_v7  ;;  %v355_v14 = vld [vmem:[%s1784_s16 + $0x10] sm:$0xff] (!%p1017_p9)  ;;  %v356_v15 = vld [vmem:[%s1784_s16 + $0x18] sm:$0xff] (!%p1017_p9)  ;;  %v506_v22 = vadd.s32 (!%p1017_p9), 16, %v504_v21  ;;  %v510_v23 = vadd.s32 (!%p1017_p9), 48, %v504_v21  ;;  %v508_v25 = vadd.s32 (!%p1017_p9), 32, %v504_v21  ;;  %v507_v26 = vadd.s32 (!%p1017_p9), 24, %v504_v21 }
  0xa6   : > { %1094 = vmatprep.mubr.bf16.mxu1 (!%p1017_p9), %v363_v9  ;;  %v359_v16 = vld [vmem:[%s1784_s16 + $0x30] sm:$0xff] (!%p1017_p9)  ;;  %v360_v17 = vld [vmem:[%s1784_s16 + $0x38] sm:$0xff] (!%p1017_p9)  ;;  %v362_v18 = vpack.c.bf16 (!%p1017_p9), %v356_v15, %v355_v14  ;;  %v511_v27 = vadd.s32 (!%p1017_p9), 56, %v504_v21  ;;  %v505_v28 = vadd.s32 (!%p1017_p9), 8, %v504_v21  ;;  %v509_v29 = vadd.s32 (!%p1017_p9), 40, %v504_v21 }
  0xa7   : > { %1077 = vmatpush3.bf16.msra.mxu0 (!%p1017_p9), %v1257_v1  ;;  %1107 = vmatpush3.bf16.msra.mxu1 (!%p1017_p9), %v1257_v1  ;;  %v364_v19 = vpack.c.bf16 (!%p1017_p9), %v360_v17, %v359_v16  ;;  %v515_v30 = vadd.s32 (!%p1017_p9), %v512_v24, %v506_v22  ;;  %v519_v31 = vadd.s32 (!%p1017_p9), %v512_v24, %v510_v23 }
  0xa8   : > { %1078 = vmatprep.subr.bf16.mxu0 (!%p1017_p9), %v1258_v2  ;;  %1100 = vmatprep.subr.bf16.mxu1 (!%p1017_p9), %v1258_v2  ;;  %v513_v32 = vadd.s32 (!%p1017_p9), %v512_v24, %v504_v21  ;;  %v517_v33 = vadd.s32 (!%p1017_p9), %v512_v24, %v508_v25  ;;  %v516_v34 = vadd.s32 (!%p1017_p9), %v512_v24, %v507_v26 }
  0xa9   : > { %v520_v35 = vadd.s32 %v512_v24, %v511_v27  ;;  %v514_v36 = vadd.s32 %v512_v24, %v505_v28  ;;  %v518_v37 = vadd.s32 %v512_v24, %v509_v29  ;;  %vm523_vm0 = vcmp.lt.s32.totalorder %v515_v30, 200 }
  0xaa   : > { %vm527_vm1 = vcmp.lt.s32.totalorder %v519_v31, 200  ;;  %vm521_vm2 = vcmp.lt.s32.totalorder %v513_v32, 200  ;;  %vm525_vm3 = vcmp.lt.s32.totalorder %v517_v33, 200  ;;  %vm524_vm4 = vcmp.lt.s32.totalorder %v516_v34, 200 }
  0xab   : > { %1079 = vmatpush3.bf16.msra.mxu0 %v1258_v2  ;;  %1108 = vmatpush3.bf16.msra.mxu1 %v1258_v2  ;;  %vm528_vm5 = vcmp.lt.s32.totalorder %v520_v35, 200  ;;  %vm522_vm6 = vcmp.lt.s32.totalorder %v514_v36, 200  ;;  %vm526_vm7 = vcmp.lt.s32.totalorder %v518_v37, 200  ;;  %v1511_v54 = vmov (!%p1026_p0), 0.0  }
  0xac   : > { %1080 = vmatprep.subr.bf16.mxu0 %v1259_v3  ;;  %1101 = vmatprep.subr.bf16.mxu1 %v1259_v3  ;;  %557 = vst [vmem:[#allocation3] sm:$0x3] (!%p1026_p0), %v1511_v54 }
  0xaf   : > { %1081 = vmatpush3.bf16.msra.mxu0 %v1259_v3  ;;  %1109 = vmatpush3.bf16.msra.mxu1 %v1259_v3 }
  0xb0   : > { %1082 = vmatprep.subr.bf16.mxu0 %v1260_v10  ;;  %1102 = vmatprep.subr.bf16.mxu1 %v1260_v10 }
  0xb3   : > { %1083 = vmatpush3.bf16.msra.mxu0 %v1260_v10  ;;  %1110 = vmatpush3.bf16.msra.mxu1 %v1260_v10 }
  0xb4   : > { %1084 = vmatprep.subr.bf16.mxu0 %v1261_v11  ;;  %1103 = vmatprep.subr.bf16.mxu1 %v1261_v11 }
  0xb7   : > { %1085 = vmatpush3.bf16.msra.mxu0 %v1261_v11  ;;  %1111 = vmatpush3.bf16.msra.mxu1 %v1261_v11 }
  0xb8   : > { %1086 = vmatprep.subr.bf16.mxu0 %v1262_v12  ;;  %1104 = vmatprep.subr.bf16.mxu1 %v1262_v12 }
  0xbb   : > { %1087 = vmatpush3.bf16.msra.mxu0 %v1262_v12  ;;  %1112 = vmatpush3.bf16.msra.mxu1 %v1262_v12 }
  0xbc   : > { %1088 = vmatprep.subr.bf16.mxu0 %v1263_v13  ;;  %1105 = vmatprep.subr.bf16.mxu1 %v1263_v13 }
  0xbf   : > { %1089 = vmatpush3.bf16.msra.mxu0 %v1263_v13  ;;  %1113 = vmatpush3.bf16.msra.mxu1 %v1263_v13 }
  0xc2   : > { %1091 = vmatmul.mubr.bf16.vlgmr.msra.gmra.mrb[0].mxu0 %v362_v18  ;;  %1095 = vmatmul.mubr.bf16.vlgmr.msra.gmra.mrb[0].mxu1 %v364_v19 }
 0x193   : > { %556 = sbr.rel (%p1026_p0) target bundleno = 410 (0x19a), region = 64 }
 0x195   : > { %v1092_v38 = vpop.f32.mrb[0].mxu0  ;;  %v1096_v39 = vpop.f32.mrb[0].mxu1 }
 0x196   : > { %497 = vst [vmem:[%s494_s18 + $0x10] sm:$0xff] %v1092_v38  ;;  %v547_v40 = vsel %vm523_vm0, %v1092_v38, 0.0  ;;  %501 = vst [vmem:[%s494_s18 + $0x30] sm:$0xff] %v1096_v39  ;;  %v551_v41 = vsel %vm527_vm1, %v1096_v39, 0.0  ;;  %v463_v42 = vpop.f32.mrb[1].mxu0  ;;  %v479_v43 = vpop.f32.mrb[1].mxu1 }
 0x197   : > { %495 = vst [vmem:[%s494_s18] sm:$0xff] %v463_v42  ;;  %v545_v44 = vsel %vm521_vm2, %v463_v42, 0.0  ;;  %499 = vst [vmem:[%s494_s18 + $0x20] sm:$0xff] %v479_v43  ;;  %v549_v45 = vsel %vm525_vm3, %v479_v43, 0.0  ;;  %v1093_v46 = vpop.f32.mrb[2].mxu0  ;;  %v1097_v47 = vpop.f32.mrb[2].mxu1 }
 0x198   : > { %498 = vst [vmem:[%s494_s18 + $0x18] sm:$0xff] %v1093_v46  ;;  %v548_v48 = vsel %vm524_vm4, %v1093_v46, 0.0  ;;  %502 = vst [vmem:[%s494_s18 + $0x38] sm:$0xff] %v1097_v47  ;;  %v552_v49 = vsel %vm528_vm5, %v1097_v47, 0.0  ;;  %v466_v50 = vpop.f32.mrb[3].mxu0  ;;  %v482_v51 = vpop.f32.mrb[3].mxu1 }
 0x199   : > { %496 = vst [vmem:[%s494_s18 + $0x8] sm:$0xff] %v466_v50  ;;  %v546_v52 = vsel %vm522_vm6, %v466_v50, 0.0  ;;  %500 = vst [vmem:[%s494_s18 + $0x28] sm:$0xff] %v482_v51  ;;  %v550_v53 = vsel %vm526_vm7, %v482_v51, 0.0 }
 0x19a PF: > { %v559_v55 = vadd.f32 %v546_v52, %v545_v44  ;;  %v575_v56 = vmul.f32 %v545_v44, %v545_v44  ;;  %v576_v57 = vmul.f32 %v546_v52, %v546_v52  ;;  %v577_v58 = vmul.f32 %v547_v40, %v547_v40  ;;  %v558_v22 = vld [vmem:[#allocation3] sm:$0x1]  ;;  %v574_v25 = vld [vmem:[#allocation3 + $0x1] sm:$0x1] }
 0x19b   : > { %v578_v60 = vmul.f32 %v548_v48, %v548_v48  ;;  %v579_v63 = vmul.f32 %v549_v45, %v549_v45  ;;  %v580_v2 = vmul.f32 %v550_v53, %v550_v53  ;;  %v581_v5 = vmul.f32 %v551_v41, %v551_v41 }
 0x19c   : > { %v560_v59 = vadd.f32 %v559_v55, %v547_v40  ;;  %v583_v61 = vadd.f32 %v576_v57, %v575_v56  ;;  %v582_v8 = vmul.f32 %v552_v49, %v552_v49 }
 0x19e   : > { %v561_v62 = vadd.f32 %v560_v59, %v548_v48  ;;  %v584_v0 = vadd.f32 %v583_v61, %v577_v58 }
 0x1a0   : > { %v562_v1 = vadd.f32 %v561_v62, %v549_v45  ;;  %v585_v3 = vadd.f32 %v584_v0, %v578_v60 }
 0x1a2   : > { %v563_v4 = vadd.f32 %v562_v1, %v550_v53  ;;  %v586_v6 = vadd.f32 %v585_v3, %v579_v63 }
 0x1a4   : > { %v564_v7 = vadd.f32 %v563_v4, %v551_v41  ;;  %v587_v9 = vadd.f32 %v586_v6, %v580_v2 }
 0x1a6   : > { %v565_v10 = vadd.f32 %v564_v7, %v552_v49  ;;  %v588_v11 = vadd.f32 %v587_v9, %v581_v5 }
 0x1a8   : > { %v566_v12 = vrot.slane %v565_v10, 4  ;;  %v589_v13 = vadd.f32 %v588_v11, %v582_v8 }
 0x1aa   : > { %v567_v14 = vadd.f32 %v566_v12, %v565_v10  ;;  %v590_v15 = vrot.slane %v589_v13, 4 }
 0x1ac   : > { %v568_v16 = vrot.slane %v567_v14, 2  ;;  %v591_v17 = vadd.f32 %v590_v15, %v589_v13 }
 0x1ae   : > { %v569_v18 = vadd.f32 %v568_v16, %v567_v14  ;;  %v592_v19 = vrot.slane %v591_v17, 2 }
 0x1b0   : > { %v570_v20 = vrot.slane %v569_v18, 1  ;;  %v593_v21 = vadd.f32 %v592_v19, %v591_v17 }
 0x1b2   : > { %v571_v23 = vadd.f32 %v570_v20, %v569_v18  ;;  %v594_v24 = vrot.slane %v593_v21, 1 }
 0x1b4   : > { %v572_v26 = vadd.f32 %v571_v23, %v558_v22  ;;  %v595_v27 = vadd.f32 %v594_v24, %v593_v21 }
 0x1b6   : > { %573 = vst [vmem:[#allocation3] sm:$0x1] %v572_v26  ;;  %v596_v28 = vadd.f32 %v595_v27, %v574_v25 }
 0x1b8   : > { %597 = vst [vmem:[#allocation3 + $0x1] sm:$0x1] %v596_v28 }
 0x1b9 PF: > { %s1986_s12 = sld [smem:[#allocation15_spill]] }
 0x1bf   : > { %p1027_p1 = scmp.ne.s32.totalorder %s1986_s12, 1 }
 0x1c0   : > { %p1028_p2 = scmp.ne.s32.totalorder (!%p1027_p1), %s1484_s27, 0 }
 0x1c1   : > { %601 = sbr.rel (%p1027_p1) target bundleno = 745 (0x2e9), region = 68 }
 0x1c8   : > { %605 = sbr.rel (%p1028_p2) target bundleno = 485 (0x1e5), region = 72  ;;  %v606_v29 = vld [vmem:[#allocation3] sm:$0x1] (!%p1028_p2)  ;;  %v608_v30 = vld [vmem:[#allocation3 + $0x1] sm:$0x1] (!%p1028_p2)  ;;  %s1987_s13 = sld [smem:[#allocation22_spill]] (!%p1028_p2) }
 0x1c9   : > { %v607_v31 = vmul.f32 (!%p1028_p2), 0.005, %v606_v29  ;;  %v609_v32 = vmul.f32 (!%p1028_p2), 0.005, %v608_v30  ;;  %s1988_s17 = sld [smem:[#allocation23_spill]] (!%p1028_p2) }
 0x1cb   : > { %v610_v33 = vmul.f32 (!%p1028_p2), %v607_v31, %v607_v31 }
 0x1cd   : > { %v611_v34 = vsub.f32 (!%p1028_p2), %v609_v32, %v610_v33 }
 0x1ce   : > { %v613_v37 = vld [vmem:[%s1987_s13] sm:$0x1] (!%p1028_p2) }
 0x1cf   : > { %v612_v35 = vmax.f32 %v611_v34, 0.0  ;;  %v618_v40 = vld [vmem:[%s1988_s17] sm:$0x1] }
 0x1d1   : > { %v614_v36 = vadd.f32 1e-05, %v612_v35 }
 0x1d3   : > { %1264 = vrsqrt.f32 %v614_v36 }
 0x1dd   : > { %v1265_v38 = vpop.eup %1264 }
 0x1de   : > { %v616_v39 = vmul.f32 %v1265_v38, %v613_v37 }
 0x1e0   : > { %617 = vst [vmem:[#allocation4] sm:$0x1] %v616_v39  ;;  %v619_v41 = vmul.f32 %v616_v39, %v607_v31 }
 0x1e2   : > { %v620_v42 = vsub.f32 %v618_v40, %v619_v41 }
 0x1e4   : > { %621 = vst [vmem:[#allocation4 + $0x1] sm:$0x1] %v620_v42 }
 0x1e5 PF: > { %v1266_v43 = vld [vmem:[#allocation10 + $0x4] ss:$8 sps:$4 sm:$0xff]   ;;  %v1268_v44 = vld [vmem:[#allocation10] ss:$8 sps:$4 sm:$0xff]   ;;  %v1512_v45 = vmov 0   ;;  %s1830_s30 = scalar_lea.vmem [#allocation2], %s1796_s15  ;;  %v687_v34 = vlaneseq }
 0x1e6   : > { %809 = vmatprep.mubr.bf16.mxu0 %v1512_v45  ;;  %829 = vmatprep.mubr.bf16.mxu1 %v1512_v45  ;;  %v1269_v46 = vld [vmem:[#allocation10 + $0x14] ss:$8 sps:$4 sm:$0xff]   ;;  %v1271_v47 = vld [vmem:[#allocation10 + $0x10] ss:$8 sps:$4 sm:$0xff]   ;;  %v1272_v48 = vld [vmem:[#allocation10 + $0x24] ss:$8 sps:$4 sm:$0xff]  }
 0x1e7   : > { %777 = vmatprep.subr.bf16.mxu0 %v1266_v43  ;;  %1114 = vmatprep.subr.bf16.mxu1 %v1266_v43  ;;  %v1274_v49 = vld [vmem:[#allocation10 + $0x20] ss:$8 sps:$4 sm:$0xff]   ;;  %v1275_v50 = vld [vmem:[#allocation10 + $0x34] ss:$8 sps:$4 sm:$0xff]   ;;  %v1277_v51 = vld [vmem:[#allocation10 + $0x30] ss:$8 sps:$4 sm:$0xff]  }
 0x1e8   : > { %778 = vmatpush1.bf16.msra.mxu0 %v1268_v44  ;;  %1122 = vmatpush1.bf16.msra.mxu1 %v1268_v44  ;;  %v1278_v52 = vld [vmem:[#allocation10 + $0x44] ss:$8 sps:$4 sm:$0xff]   ;;  %v1280_v53 = vld [vmem:[#allocation10 + $0x40] ss:$8 sps:$4 sm:$0xff]   ;;  %v1029_v55 = vld [vmem:[#allocation4] ss:$0 sm:$0xff] }
 0x1e9   : > { %779 = vmatprep.subr.bf16.mxu0 %v1269_v46  ;;  %1115 = vmatprep.subr.bf16.mxu1 %v1269_v46  ;;  %v623_v54 = vld [vmem:[%s1830_s30] sm:$0xff]  ;;  %v624_v56 = vld [vmem:[%s1830_s30 + $0x8] sm:$0xff]  ;;  %v1283_v1 = vld [vmem:[#allocation10 + $0x50] ss:$8 sps:$4 sm:$0xff]   ;;  %v688_v35 = vshrl.u32 %v687_v34, 7  ;;  %s1989_s20 = sld [smem:[#allocation24_spill]] }
 0x1ea   : > { %v627_v57 = vld [vmem:[%s1830_s30 + $0x20] sm:$0xff]  ;;  %v628_v58 = vld [vmem:[%s1830_s30 + $0x28] sm:$0xff]  ;;  %v636_v60 = vmul.f32 %v1029_v55, %v623_v54  ;;  %v637_v61 = vmul.f32 %v1029_v55, %v624_v56  ;;  %v625_v7 = vld [vmem:[%s1830_s30 + $0x10] sm:$0xff] }
 0x1eb   : > { %v1281_v59 = vld [vmem:[#allocation10 + $0x54] ss:$8 sps:$4 sm:$0xff]   ;;  %v640_v63 = vmul.f32 %v1029_v55, %v627_v57  ;;  %v641_v0 = vmul.f32 %v1029_v55, %v628_v58  ;;  %v1284_v2 = vld [vmem:[#allocation10 + $0x64] ss:$8 sps:$4 sm:$0xff]   ;;  %v1286_v10 = vld [vmem:[#allocation10 + $0x60] ss:$8 sps:$4 sm:$0xff]   ;;  %v638_v14 = vmul.f32 %v1029_v55, %v625_v7 }
 0x1ec   : > { %780 = vmatpush1.bf16.msra.mxu0 %v1271_v47  ;;  %1123 = vmatpush1.bf16.msra.mxu1 %v1271_v47  ;;  %v1030_v62 = vld [vmem:[#allocation4 + $0x1] ss:$0 sm:$0xff]  ;;  %v626_v8 = vld [vmem:[%s1830_s30 + $0x18] sm:$0xff]  ;;  %v629_v9 = vld [vmem:[%s1830_s30 + $0x30] sm:$0xff]  ;;  %v689_v36 = vsub.s32 0, %v688_v35  ;;  %v693_v38 = vsub.s32 1, %v688_v35 }
 0x1ed   : > { %781 = vmatprep.subr.bf16.mxu0 %v1272_v48  ;;  %1116 = vmatprep.subr.bf16.mxu1 %v1272_v48  ;;  %v649_v3 = vadd.f32 %v1030_v62, %v636_v60  ;;  %v650_v4 = vadd.f32 %v1030_v62, %v637_v61  ;;  %v653_v5 = vadd.f32 %v1030_v62, %v640_v63  ;;  %v630_v11 = vld [vmem:[%s1830_s30 + $0x38] sm:$0xff] }
 0x1ee   : > { %v654_v6 = vadd.f32 %v1030_v62, %v641_v0  ;;  %v1287_v12 = vld [vmem:[#allocation10 + $0x74] ss:$8 sps:$4 sm:$0xff]   ;;  %v639_v15 = vmul.f32 %v1029_v55, %v626_v8  ;;  %v642_v16 = vmul.f32 %v1029_v55, %v629_v9  ;;  %v643_v20 = vmul.f32 %v1029_v55, %v630_v11  ;;  %v1289_v21 = vld [vmem:[#allocation10 + $0x70] ss:$8 sps:$4 sm:$0xff]  }
 0x1ef   : > { %v657_v13 = vmax.f32 %v649_v3, 0.0  ;;  %v658_v17 = vmax.f32 %v650_v4, 0.0  ;;  %v661_v18 = vmax.f32 %v653_v5, 0.0  ;;  %v651_v22 = vadd.f32 %v1030_v62, %v638_v14  ;;  %v685_v37 = vld [vmem:[%s1989_s20] sm:$0x3] }
 0x1f0   : > { %782 = vmatpush1.bf16.msra.mxu0 %v1274_v49  ;;  %1124 = vmatpush1.bf16.msra.mxu1 %v1274_v49  ;;  %v662_v19 = vmax.f32 %v654_v6, 0.0  ;;  %v652_v23 = vadd.f32 %v1030_v62, %v639_v15  ;;  %v655_v26 = vadd.f32 %v1030_v62, %v642_v16  ;;  %v656_v27 = vadd.f32 %v1030_v62, %v643_v20 }
 0x1f1   : > { %783 = vmatprep.subr.bf16.mxu0 %v1275_v50  ;;  %1117 = vmatprep.subr.bf16.mxu1 %v1275_v50  ;;  %v665_v24 = vpack.c.bf16 %v658_v17, %v657_v13  ;;  %v659_v28 = vmax.f32 %v651_v22, 0.0  ;;  %v690_v39 = vrot.slane %v685_v37, %v689_v36  ;;  %v694_v40 = vrot.slane %v685_v37, %v693_v38 }
 0x1f2   : > { %v667_v25 = vpack.c.bf16 %v662_v19, %v661_v18  ;;  %v660_v29 = vmax.f32 %v652_v23, 0.0  ;;  %v663_v30 = vmax.f32 %v655_v26, 0.0  ;;  %v664_v31 = vmax.f32 %v656_v27, 0.0 }
 0x1f4   : > { %784 = vmatpush1.bf16.msra.mxu0 %v1277_v51  ;;  %1125 = vmatpush1.bf16.msra.mxu1 %v1277_v51  ;;  %v666_v32 = vpack.c.bf16 %v660_v29, %v659_v28  ;;  %v668_v33 = vpack.c.bf16 %v664_v31, %v663_v30 }
 0x1f5   : > { %785 = vmatprep.subr.bf16.mxu0 %v1278_v52  ;;  %1118 = vmatprep.subr.bf16.mxu1 %v1278_v52 }
 0x1f8   : > { %786 = vmatpush1.bf16.msra.mxu0 %v1280_v53  ;;  %1126 = vmatpush1.bf16.msra.mxu1 %v1280_v53 }
 0x1f9   : > { %787 = vmatprep.subr.bf16.mxu0 %v1281_v59  ;;  %1119 = vmatprep.subr.bf16.mxu1 %v1281_v59 }
 0x1fc   : > { %788 = vmatpush1.bf16.msra.mxu0 %v1283_v1  ;;  %1127 = vmatpush1.bf16.msra.mxu1 %v1283_v1 }
 0x1fd   : > { %789 = vmatprep.subr.bf16.mxu0 %v1284_v2  ;;  %1120 = vmatprep.subr.bf16.mxu1 %v1284_v2 }
 0x200   : > { %790 = vmatpush1.bf16.msra.mxu0 %v1286_v10  ;;  %1128 = vmatpush1.bf16.msra.mxu1 %v1286_v10 }
 0x201   : > { %791 = vmatprep.subr.bf16.mxu0 %v1287_v12  ;;  %1121 = vmatprep.subr.bf16.mxu1 %v1287_v12 }
 0x204   : > { %792 = vmatpush1.bf16.msra.mxu0 %v1289_v21  ;;  %1129 = vmatpush1.bf16.msra.mxu1 %v1289_v21 }
 0x207   : > { %810 = vmatmul.mubr.bf16.vlgmr.msra.gmra.mrb[0].mxu0 %v665_v24  ;;  %830 = vmatmul.mubr.bf16.vlgmr.msra.gmra.mrb[0].mxu1 %v667_v25 }
 0x208   : > { %819 = vmatprep.mubr.bf16.mxu0 %v1512_v45  ;;  %839 = vmatprep.mubr.bf16.mxu1 %v1512_v45 }
 0x20f   : > { %820 = vmatmul.mubr.bf16.gmra.mrb[4].mxu0 %v666_v32  ;;  %840 = vmatmul.mubr.bf16.gmra.mrb[4].mxu1 %v668_v33 }
 0x2da   : > { %v811_v41 = vpop.f32.mrb[0].mxu0  ;;  %v831_v42 = vpop.f32.mrb[0].mxu1 }
 0x2db   : > { %v812_v43 = vadd.f32 %v811_v41, %v690_v39  ;;  %v832_v44 = vadd.f32 %v831_v42, %v690_v39  ;;  %v813_v45 = vpop.f32.mrb[1].mxu0  ;;  %v833_v46 = vpop.f32.mrb[1].mxu1 }
 0x2dc   : > { %v814_v47 = vadd.f32 %v813_v45, %v694_v40  ;;  %v834_v48 = vadd.f32 %v833_v46, %v694_v40  ;;  %v815_v49 = vpop.f32.mrb[2].mxu0  ;;  %v835_v50 = vpop.f32.mrb[2].mxu1 }
 0x2dd   : > { %850 = vst [vmem:[%s1800_s2] sm:$0xff] %v812_v43  ;;  %858 = vst [vmem:[%s1800_s2 + $0x40] sm:$0xff] %v832_v44  ;;  %v816_v51 = vadd.f32 %v815_v49, %v690_v39  ;;  %v836_v52 = vadd.f32 %v835_v50, %v690_v39  ;;  %v817_v53 = vpop.f32.mrb[3].mxu0  ;;  %v837_v54 = vpop.f32.mrb[3].mxu1 }
 0x2de   : > { %851 = vst [vmem:[%s1800_s2 + $0x8] sm:$0xff] %v814_v47  ;;  %859 = vst [vmem:[%s1800_s2 + $0x48] sm:$0xff] %v834_v48  ;;  %v818_v55 = vadd.f32 %v817_v53, %v694_v40  ;;  %v838_v56 = vadd.f32 %v837_v54, %v694_v40 }
 0x2df   : > { %852 = vst [vmem:[%s1800_s2 + $0x10] sm:$0xff] %v816_v51  ;;  %860 = vst [vmem:[%s1800_s2 + $0x50] sm:$0xff] %v836_v52 }
 0x2e0   : > { %853 = vst [vmem:[%s1800_s2 + $0x18] sm:$0xff] %v818_v55  ;;  %861 = vst [vmem:[%s1800_s2 + $0x58] sm:$0xff] %v838_v56 }
 0x2e2   : > { %v821_v57 = vpop.f32.mrb[4].mxu0  ;;  %v841_v58 = vpop.f32.mrb[4].mxu1 }
 0x2e3   : > { %v822_v59 = vadd.f32 %v821_v57, %v690_v39  ;;  %v842_v60 = vadd.f32 %v841_v58, %v690_v39  ;;  %v823_v61 = vpop.f32.mrb[5].mxu0  ;;  %v843_v62 = vpop.f32.mrb[5].mxu1 }
 0x2e4   : > { %v824_v63 = vadd.f32 %v823_v61, %v694_v40  ;;  %v844_v0 = vadd.f32 %v843_v62, %v694_v40  ;;  %v825_v1 = vpop.f32.mrb[6].mxu0  ;;  %v845_v2 = vpop.f32.mrb[6].mxu1 }
 0x2e5   : > { %854 = vst [vmem:[%s1800_s2 + $0x20] sm:$0xff] %v822_v59  ;;  %862 = vst [vmem:[%s1800_s2 + $0x60] sm:$0xff] %v842_v60  ;;  %v826_v3 = vadd.f32 %v825_v1, %v690_v39  ;;  %v846_v4 = vadd.f32 %v845_v2, %v690_v39  ;;  %v827_v5 = vpop.f32.mrb[7].mxu0  ;;  %v847_v6 = vpop.f32.mrb[7].mxu1 }
 0x2e6   : > { %855 = vst [vmem:[%s1800_s2 + $0x28] sm:$0xff] %v824_v63  ;;  %863 = vst [vmem:[%s1800_s2 + $0x68] sm:$0xff] %v844_v0  ;;  %v828_v7 = vadd.f32 %v827_v5, %v694_v40  ;;  %v848_v8 = vadd.f32 %v847_v6, %v694_v40 }
 0x2e7   : > { %856 = vst [vmem:[%s1800_s2 + $0x30] sm:$0xff] %v826_v3  ;;  %864 = vst [vmem:[%s1800_s2 + $0x70] sm:$0xff] %v846_v4 }
 0x2e8   : > { %857 = vst [vmem:[%s1800_s2 + $0x38] sm:$0xff] %v828_v7  ;;  %865 = vst [vmem:[%s1800_s2 + $0x78] sm:$0xff] %v848_v8 }
 0x2e9 PF: > { %s1863_s24 = scalar_lea.sflag [#allocation7], %s328_s5  ;;  %p1990_p8 = scmp.ne.s32.totalorder %s1976_s28, 0 }
 0x2ea   : > { %s1991_s16 = sld [smem:[#allocation15_spill]] (%p1990_p8) }
 0x2eb   : > { %873 = sbr.rel (!%p1990_p8) target bundleno = 787 (0x313), region = 76 }
 0x2f0   : > { %s874_s15 = smul.u32 (%p1990_p8), %s1484_s27, %s1991_s16 }
 0x2f2   : > { %s1048_s3 = sshll.u32 %s874_s15, 3 }
 0x2f3   : > { %s876_s29 = ssub.s32 25, %s1048_s3 }
 0x2f4   : > { %p877_p3 = scmp.lt.s32.totalorder %s876_s29, 8 }
 0x2f6   : > { %s2015_s29 = smov (!%p877_p3, %s876_s29), 8 }
 0x2f7   : > { %s1869_s18 = sshll.u32 %s2015_s29, 8 }
 0x2f8   : > { %s882_s12 = ssub.s32 2048, %s1869_s18 }
 0x2f9   : > { %883 = vsyncadd %s1863_s24, %s882_s12  ;;  %p1051_p11 = scmp.ne.s32.totalorder %s1869_s18, 0  ;;  %s1061_s28 = sshll.u32 %s874_s15, 11 }
 0x2fa   : > { %s1992_s11 = sld [smem:[#allocation25_spill]]  ;;  %s889_s27 = sshll.u32 %s1800_s2, 4  ;;  %s1880_s27 = int_to_ptr.vmem [resolvable:$true] %s889_s27 }
 0x2fb   : > { %s1374_s9 = scalar_lea.vmem %s1880_s27, %s1869_s18  ;;  %s1513_s14 = smov [#allocation11]  }
 0x2fc   : > { %p1375_p5 = scmp.ne.s32.totalorder %s1880_s27, %s1374_s9  ;;  %s1378_s17 = sshll.u32 %s1513_s14, 4  ;;  %s1379_s17 = int_to_ptr.vmem [resolvable:$false] %s1378_s17 }
 0x2fd   : > { %s1380_s30 = scalar_lea.vmem %s1379_s17, 4096  ;;  %p1381_p4 = scmp.lt.s32.totalorder %s1880_s27, %s1379_s17 }
 0x2fe   : > { %p1376_p6 = pnand %p1375_p5, %p1051_p11  ;;  %p1382_p12 = scmp.lt.s32.totalorder %s1380_s30, %s1374_s9 }
 0x300   : > { %s1877_s13 = scalar_lea.hbm %s1992_s11, %s1061_s28  ;;  %p1377_p7 = pneg %p1376_p6 }
 0x301   : > { %p1383_p10 = por %p1382_p12, %p1381_p4 }
 0x303   : > { %p1384_p13 = pnand %p1383_p10, %p1377_p7 }
 0x305   : > { %1387 = shalt.err (!%p1384_p13)
}
 0x306   : > { %s1388_s2 = scalar_lea.hbm %s1877_s13, %s1869_s18  ;;  %s1392_s20 = scalar_lea.hbm %s1992_s11, 6400 }
 0x307   : > { %p1389_p9 = scmp.ne.s32.totalorder %s1877_s13, %s1388_s2  ;;  %p1393_p2 = scmp.lt.u32.totalorder %s1877_s13, %s1992_s11 }
 0x308   : > { %p1394_p8 = scmp.lt.u32.totalorder %s1392_s20, %s1388_s2  ;;  %p1396_p5 = scmp.lt.u32.totalorder %s1388_s2, %s1877_s13 }
 0x309   : > { %p1390_p0 = pnand %p1389_p9, %p1051_p11 }
 0x30a   : > { %p1395_p3 = por %p1394_p8, %p1393_p2 }
 0x30b   : > { %p1391_p1 = pneg %p1390_p0 }
 0x30c   : > { %p1397_p6 = por %p1396_p5, %p1395_p3 }
 0x30e   : > { %p1398_p7 = pnand %p1397_p6, %p1391_p1 }
 0x310   : > { %1401 = shalt.err (!%p1398_p7)
}
 0x311   : > { %s1514_s3 = smov 256   ;;  %s1515_s29 = smov 16  }
 0x312   : > { %895 = dma.vmem_to_hbm [thread:$0]  (%p1051_p11), %s1880_s27, %s1869_s18, %s1877_s13, %s1863_s24, %s1514_s3, %s1514_s3, %s1515_s29  }
 0x313 PF: > { %p1155_p4 = scmp.ge.s32.totalorder %s1500_s7, 2  ;;  %s904_s12 = sand.u32 1, %s1460_s21  }
 0x314   : > { %p1993_p12 = scmp.ne.s32.totalorder %s1978_s6, 0  ;;  %s905_s28 = scalar_lea.sflag [#allocation7], %s904_s12 }
 0x316   : > { %p1148_p10 = pnand %p1155_p4, %p1993_p12 }
 0x318   : > { %1455 = dma.done.wait (!%p1148_p10), %s905_s28, 2048  }
 0x319   : > { %1457 = vsyncadd (!%p1148_p10), %s905_s28, 4294965248  ;;  %s23_s7 = sadd.s32 1, %s1500_s7   ;;  %s1994_s5 = sld [smem:[#allocation21_spill]] }
 0x31a   : > { %p20_p13 = scmp.ge.s32.totalorder %s23_s7, 10   ;;  %s1995_s18 = sld [smem:[#allocation20_spill]] }
 0x31b   : > { %s1996_s27 = sld [smem:[#allocation16_spill]]  ;;  %s1997_s28 = sld [smem:[#allocation17_spill]] }
 0x31c   : > { %s1998_s29 = sld [smem:[#allocation18_spill]]  ;;  %s1999_s30 = sld [smem:[#allocation19_spill]] }
 0x31d   : > { %s2000_s21 = smov %s1464_s22  ;;  %s2001_s22 = smov %s1468_s23 }
 0x31e   : > { %s2003_s24 = smov %s1476_s25  ;;  %s2004_s25 = smov %s1480_s26 }
 0x31f   : > { %s2002_s23 = smov %s1994_s5  ;;  %22 = sbr.rel (!%p20_p13) target bundleno = 15 (0xf), region = 115 }
 0x320   : > { %s2005_s26 = smov %s1995_s18 }
 0x326   :  { %910 = vsyncpa [#allocation6], 1 }
 0x327   :  { %912 = vsyncpa [#allocation6 + $0x1], 1 }
 0x328   :  { %913 = vsyncpa [#allocation9], 1 }
 0x329   :  { %914 = vsyncpa [#allocation7], 1 }
 0x32a   :  { %916 = vsyncpa [#allocation7 + $0x1], 1 }

</bundles_post_ra>
